<compile_context>
chip_gen: v7x
topology: tpu7x:2x2x1
jax: 0.10.0
libtpu: 0.0.40
codegen_flags: <defaults>
</compile_context>

<pallas_src>
import functools

import jax
import jax.numpy as jnp
from jax import lax
from jax.experimental import pallas as pl
from jax.experimental.pallas import tpu as pltpu


def _round_up(x, m):
    return (x + m - 1) // m * m


def _atloss_kernel(logits_ref, labels_ref, loss_ref, *, b_true, tb):
    """One batch tile: per-row ATLoss; rows past the true batch are zeroed."""
    i = pl.program_id(0)

    logits = logits_ref[...].astype(jnp.float32)   # [TB, C] f32 compute
    TB, C = logits.shape

    col = lax.broadcasted_iota(jnp.int32, (TB, C), 1)
    is_col0 = col == 0

    lab = labels_ref[...]                          # native dtype, no wrapper cast
    if jnp.issubdtype(lab.dtype, jnp.floating):
        lab_pos = lab > jnp.asarray(0.5, lab.dtype)
    else:
        lab_pos = lab > 0
    # labels with the threshold column (col 0) forced to 0, as booleans.
    lab_bool = jnp.logical_and(lab_pos, jnp.logical_not(is_col0))

    # ---- shared row max + single exp pass -----------------------------------
    # lse over a masked subset S: m + log(sum_{j in S} exp(logits_j - m)).
    # One exp per element instead of two masked-subtract-exp chains.
    m = jnp.max(logits, axis=-1, keepdims=True)                     # [TB, 1]
    e = jnp.exp(logits - m)                                         # [TB, C]
    zero = jnp.float32(0.0)

    # path 1: positives + threshold class
    mask1 = jnp.logical_or(lab_bool, is_col0)
    sum1 = jnp.sum(jnp.where(mask1, e, zero), axis=-1, keepdims=True)
    # path 2: negatives + threshold class (everything that is not a positive)
    sum2 = jnp.sum(jnp.where(lab_bool, zero, e), axis=-1, keepdims=True)

    # Tiny clamp: guards against log(0)/0*inf when a row's kept logits sit
    # >~87 log-units below the row max (out of any sane logit range); costs
    # one VPU max on a [TB, 1] vector.
    tiny = jnp.float32(jnp.finfo(jnp.float32).tiny)
    lse1 = m + jnp.log(jnp.maximum(sum1, tiny))
    lse2 = m + jnp.log(jnp.maximum(sum2, tiny))

    # loss1 = -(log_softmax(logit1) * labels).sum = n_pos * lse1 - sum(labels*logits)
    n_pos = jnp.sum(jnp.where(lab_bool, jnp.float32(1.0), zero),
                    axis=-1, keepdims=True)                         # [TB, 1]
    pos_dot = jnp.sum(jnp.where(lab_bool, logits, zero),
                      axis=-1, keepdims=True)                       # [TB, 1]
    loss1 = n_pos * lse1 - pos_dot

    # loss2 = -(log_softmax(logit2) * th_label).sum = lse2 - logits[:, 0]
    loss2 = lse2 - logits[:, 0:1]

    loss = loss1 + loss2                                            # [TB, 1]

    # Zero rows beyond the true batch (partial tail block); harmless for full
    # blocks and keeps the wrapper's sum/mean exact without any padding pass.
    row = lax.broadcasted_iota(jnp.int32, (TB, 1), 0) + i * tb
    loss_ref[...] = jnp.where(row < b_true, loss, zero)


def at_loss(logits, labels, *, vmem_tile_bytes=2 * 1024 * 1024):
    """ATLoss.forward: logits [B, C], labels [B, C] (0/1 multi-hot) -> scalar f32.

    `logits` may be f32 or bf16 (bf16 halves the dominant HBM stream); `labels`
    may be float (compared > 0.5) or int/bool (compared > 0).
    """
    B, C = logits.shape

    # Tile rows so one logits tile is ~vmem_tile_bytes (f32-equivalent).
    # Double-buffered inputs (2 x (logits + labels)) plus ~3-4 live [TB, C]
    # f32 temporaries then total ~16-20 MiB: under the 32 MiB limit requested
    # below on every generation (v5e 128 MiB phys, v6e 128, v7x 64).
    c_pad = _round_up(C, 128)
    budget_rows = max(8, (vmem_tile_bytes // (c_pad * 4)) // 8 * 8)
    if B <= budget_rows:
        TB = B                       # single block == full dim (always legal)
    else:
        TB = budget_rows             # multiple of 8; last block may be partial
    grid = (pl.cdiv(B, TB),)

    kernel = functools.partial(_atloss_kernel, b_true=B, tb=TB)
    per_row = pl.pallas_call(
        kernel,
        out_shape=jax.ShapeDtypeStruct((B, 1), jnp.float32),
        grid_spec=pltpu.PrefetchScalarGridSpec(
            num_scalar_prefetch=0,
            grid=grid,
            in_specs=[
                pl.BlockSpec((TB, C), lambda i: (i, 0)),
                pl.BlockSpec((TB, C), lambda i: (i, 0)),
            ],
            out_specs=pl.BlockSpec((TB, 1), lambda i: (i, 0)),
        ),
        compiler_params=pltpu.CompilerParams(
            dimension_semantics=("parallel",),
            vmem_limit_bytes=32 * 1024 * 1024,
        ),
    )(logits, labels)

    # Rows past B were zeroed / masked out; finish the mean with the true B.
    return jnp.sum(per_row) / jnp.float32(B)


def _at_loss_ref(logits, labels):
    # Pure-JAX reference mirroring the PyTorch semantics.
    logits = logits.astype(jnp.float32)
    labels = labels.astype(jnp.float32)
    th_label = jnp.zeros_like(labels).at[:, 0].set(1.0)
    labels = labels.at[:, 0].set(0.0)
    p_mask = labels + th_label
    n_mask = 1.0 - labels
    logit1 = logits - (1.0 - p_mask) * 1e30
    loss1 = -jnp.sum(jax.nn.log_softmax(logit1, axis=-1) * labels, axis=1)
    logit2 = logits - (1.0 - n_mask) * 1e30
    loss2 = -jnp.sum(jax.nn.log_softmax(logit2, axis=-1) * th_label, axis=1)
    return jnp.mean(loss1 + loss2)


# TODO(synk): ATLoss.get_label (inference-time thresholding with optional
# top-k) is not part of the forward loss and is not implemented here.

if __name__ == "__main__":
    key = jax.random.PRNGKey(0)
    k1, k2, k3, k4 = jax.random.split(key, 4)

    # --- small canonical check: single tile --------------------------------
    B, C = 8, 32  # batch of 8 samples, 32 relation classes
    logits = jax.random.normal(k1, (B, C), dtype=jnp.float32)
    labels = (jax.random.uniform(k2, (B, C)) > 0.7).astype(jnp.float32)

    loss = at_loss(logits, labels)
    jax.block_until_ready(loss)
    ref = _at_loss_ref(logits, labels)
    assert jnp.allclose(loss, ref, rtol=1e-5, atol=1e-5), (loss, ref)

    # --- tail-block check: B not a multiple of the tile (forces a partial
    # last block through the no-padding path) -------------------------------
    B2, C2 = 13, 32
    logits2 = jax.random.normal(k3, (B2, C2), dtype=jnp.float32)
    labels2 = (jax.random.uniform(k4, (B2, C2)) > 0.7).astype(jnp.float32)
    # tiny byte budget -> TB=8, grid=2, second block partial (rows 8..12)
    loss2 = at_loss(logits2, labels2, vmem_tile_bytes=4096)
    jax.block_until_ready(loss2)
    ref2 = _at_loss_ref(logits2, labels2)
    assert jnp.allclose(loss2, ref2, rtol=1e-5, atol=1e-5), (loss2, ref2)

    print("KERNEL_OK")
</pallas_src>

<mosaic_0001>
module attributes {stable_mosaic.version = 11 : i64} {
  func.func @_atloss_kernel(%arg0: i32, %arg1: memref<8x32xf32, #tpu.memory_space<vmem>>, %arg2: memref<8x32xf32, #tpu.memory_space<vmem>>, %arg3: memref<8x1xf32, #tpu.memory_space<vmem>>) attributes {dimension_semantics = [#tpu.dimension_semantics<parallel>], iteration_bounds = array<i64: 1>, scalar_prefetch = 0 : i64, scratch_operands = 0 : i64, tpu.core_type = #tpu.core_type<tc>, window_params = [{transform_indices = @transform_0, window_bounds = array<i64: 8, 32>}, {transform_indices = @transform_1, window_bounds = array<i64: 8, 32>}, {transform_indices = @transform_2, window_bounds = array<i64: 8, 1>}]} {
    %c0 = arith.constant 0 : index
    %c0_0 = arith.constant 0 : index
    %0 = vector.load %arg1[%c0, %c0_0] : memref<8x32xf32, #tpu.memory_space<vmem>>, vector<8x32xf32>
    %1 = tpu.iota {dimensions = array<i32: 1>} : vector<8x32xi32>
    %c0_i32 = arith.constant 0 : i32
    %2 = vector.broadcast %c0_i32 : i32 to vector<8x32xi32>
    %3 = arith.cmpi eq, %1, %2 : vector<8x32xi32>
    %c0_1 = arith.constant 0 : index
    %c0_2 = arith.constant 0 : index
    %4 = vector.load %arg2[%c0_1, %c0_2] : memref<8x32xf32, #tpu.memory_space<vmem>>, vector<8x32xf32>
    %cst = arith.constant 5.000000e-01 : f32
    %5 = vector.broadcast %cst : f32 to vector<8x32xf32>
    %6 = arith.cmpf ogt, %4, %5 : vector<8x32xf32>
    %cst_3 = arith.constant dense<true> : vector<8x32xi1>
    %7 = arith.xori %3, %cst_3 : vector<8x32xi1>
    %8 = arith.andi %6, %7 : vector<8x32xi1>
    %cst_4 = arith.constant dense<0xFF800000> : vector<8xf32>
    %9 = vector.multi_reduction <maximumf>, %0, %cst_4 [1] : vector<8x32xf32> to vector<8xf32>
    %10 = vector.shape_cast %9 : vector<8xf32> to vector<8x1xf32>
    %11 = vector.broadcast %10 : vector<8x1xf32> to vector<8x32xf32>
    %12 = arith.subf %0, %11 : vector<8x32xf32>
    %13 = math.exp %12 : vector<8x32xf32>
    %14 = arith.ori %8, %3 : vector<8x32xi1>
    %cst_5 = arith.constant 0.000000e+00 : f32
    %15 = vector.broadcast %cst_5 : f32 to vector<8x32xf32>
    %16 = arith.select %14, %13, %15 : vector<8x32xi1>, vector<8x32xf32>
    %cst_6 = arith.constant dense<0.000000e+00> : vector<8xf32>
    %17 = vector.multi_reduction <add>, %16, %cst_6 [1] : vector<8x32xf32> to vector<8xf32>
    %18 = vector.shape_cast %17 : vector<8xf32> to vector<8x1xf32>
    %cst_7 = arith.constant 0.000000e+00 : f32
    %19 = vector.broadcast %cst_7 : f32 to vector<8x32xf32>
    %20 = arith.select %8, %19, %13 : vector<8x32xi1>, vector<8x32xf32>
    %cst_8 = arith.constant dense<0.000000e+00> : vector<8xf32>
    %21 = vector.multi_reduction <add>, %20, %cst_8 [1] : vector<8x32xf32> to vector<8xf32>
    %22 = vector.shape_cast %21 : vector<8xf32> to vector<8x1xf32>
    %cst_9 = arith.constant 1.17549435E-38 : f32
    %23 = vector.broadcast %cst_9 : f32 to vector<8x1xf32>
    %24 = arith.maximumf %18, %23 : vector<8x1xf32>
    %25 = math.log %24 : vector<8x1xf32>
    %26 = arith.addf %10, %25 : vector<8x1xf32>
    %cst_10 = arith.constant 1.17549435E-38 : f32
    %27 = vector.broadcast %cst_10 : f32 to vector<8x1xf32>
    %28 = arith.maximumf %22, %27 : vector<8x1xf32>
    %29 = math.log %28 : vector<8x1xf32>
    %30 = arith.addf %10, %29 : vector<8x1xf32>
    %cst_11 = arith.constant 1.000000e+00 : f32
    %cst_12 = arith.constant 0.000000e+00 : f32
    %31 = vector.broadcast %cst_11 : f32 to vector<8x32xf32>
    %32 = vector.broadcast %cst_12 : f32 to vector<8x32xf32>
    %33 = arith.select %8, %31, %32 : vector<8x32xi1>, vector<8x32xf32>
    %cst_13 = arith.constant dense<0.000000e+00> : vector<8xf32>
    %34 = vector.multi_reduction <add>, %33, %cst_13 [1] : vector<8x32xf32> to vector<8xf32>
    %35 = vector.shape_cast %34 : vector<8xf32> to vector<8x1xf32>
    %cst_14 = arith.constant 0.000000e+00 : f32
    %36 = vector.broadcast %cst_14 : f32 to vector<8x32xf32>
    %37 = arith.select %8, %0, %36 : vector<8x32xi1>, vector<8x32xf32>
    %cst_15 = arith.constant dense<0.000000e+00> : vector<8xf32>
    %38 = vector.multi_reduction <add>, %37, %cst_15 [1] : vector<8x32xf32> to vector<8xf32>
    %39 = vector.shape_cast %38 : vector<8xf32> to vector<8x1xf32>
    %40 = arith.mulf %35, %26 : vector<8x1xf32>
    %41 = arith.subf %40, %39 : vector<8x1xf32>
    %42 = vector.extract_strided_slice %0 {offsets = [0, 0], sizes = [8, 1], strides = [1, 1]} : vector<8x32xf32> to vector<8x1xf32>
    %43 = arith.subf %30, %42 : vector<8x1xf32>
    %44 = arith.addf %41, %43 : vector<8x1xf32>
    %45 = tpu.iota {dimensions = array<i32: 0>} : vector<8x1xi32>
    %c8_i32 = arith.constant 8 : i32
    %46 = arith.muli %arg0, %c8_i32 : i32
    %47 = vector.broadcast %46 : i32 to vector<8x1xi32>
    %48 = arith.addi %45, %47 : vector<8x1xi32>
    %c8_i32_16 = arith.constant 8 : i32
    %49 = vector.broadcast %c8_i32_16 : i32 to vector<8x1xi32>
    %50 = arith.cmpi slt, %48, %49 : vector<8x1xi32>
    %cst_17 = arith.constant 0.000000e+00 : f32
    %51 = vector.broadcast %cst_17 : f32 to vector<8x1xf32>
    %52 = arith.select %50, %44, %51 : vector<8x1xi1>, vector<8x1xf32>
    %c0_18 = arith.constant 0 : index
    %c0_19 = arith.constant 0 : index
    %53 = vector.load %arg3[%c0_18, %c0_19] : memref<8x1xf32, #tpu.memory_space<vmem>>, vector<8x1xf32>
    tpu.vector_store %arg3[%c0_18, %c0_19], %52 {strides = array<i32>} : memref<8x1xf32, #tpu.memory_space<vmem>>, vector<8x1xf32>,
    return
  }
  func.func @transform_0(%arg0: i32) -> (i32, i32) {
    %c0_i32 = arith.constant 0 : i32
    %c0_i32_0 = arith.constant 0 : i32
    return %arg0, %c0_i32 : i32, i32
  }
  func.func @transform_1(%arg0: i32) -> (i32, i32) {
    %c0_i32 = arith.constant 0 : i32
    %c0_i32_0 = arith.constant 0 : i32
    return %arg0, %c0_i32 : i32, i32
  }
  func.func @transform_2(%arg0: i32) -> (i32, i32) {
    %c0_i32 = arith.constant 0 : i32
    %c0_i32_0 = arith.constant 0 : i32
    return %arg0, %c0_i32 : i32, i32
  }
}

</mosaic_0001>

<bundles_post_ra>
// kernel: tpu_custom_call.1
= control target key start
LH: loop header
LB: loop body
LE: loop exit
PB: predicated region body
PF: predicated region fallthrough
CT: control target
= control target key end

     0   :  { %7 = vsyncpa [#allocation3], 0  ;;  %s203_s0 = inlined_call_operand.hbm [shape: f32[8,32], index: 0, kind: input, shape index: {}]   ;;  %s204_s1 = inlined_call_operand.hbm [shape: f32[8,32], index: 1, kind: input, shape index: {}]   ;;  %s205_s2 = inlined_call_operand.vmem [shape: f32[8,1], index: 2, kind: output, shape index: {}]  }
   0x1   :  { %8 = vsyncpa [#allocation5], 0  ;;  %s152_s9 = smov [#allocation2]   ;;  %s153_s11 = smov [#allocation4]  }
   0x2   :  { %s15_s10 = sshll.u32 %s152_s9, 4  ;;  %s25_s12 = sshll.u32 %s153_s11, 4  ;;  %s16_s10 = int_to_ptr.vmem [resolvable:$true] %s15_s10  ;;  %s26_s12 = int_to_ptr.vmem [resolvable:$true] %s25_s12 }
   0x3   :  { %s104_s15 = scalar_lea.hbm %s203_s0, 128 }
   0x4   :  { %p105_p0 = scmp.ne.s32.totalorder %s203_s0, %s104_s15  ;;  %p108_p1 = scmp.lt.u32.totalorder %s104_s15, %s203_s0 }
   0x6   :  { %p110_p2 = pnand %p108_p1, %p105_p0 }
   0x8   :  { %113 = shalt.err (!%p110_p2)
}
   0x9   :  { %s114_s20 = scalar_lea.vmem %s16_s10, 128  ;;  %p119_p4 = scmp.lt.s32.totalorder %s16_s10, %s16_s10 }
   0xa   :  { %p115_p3 = scmp.ne.s32.totalorder %s16_s10, %s114_s20  ;;  %p120_p5 = scmp.lt.s32.totalorder %s114_s20, %s114_s20 }
   0xc   :  { %p121_p6 = por %p120_p5, %p119_p4 }
   0xe   :  { %p122_p7 = pnand %p121_p6, %p115_p3 }
  0x10   :  { %125 = shalt.err (!%p122_p7)
}
  0x11   :  { %18 = dma.hbm_to_vmem [thread:$0]  %s203_s0, 128, %s16_s10, [#allocation3]  }
  0x12   :  { %s126_s25 = scalar_lea.hbm %s204_s1, 128 }
  0x13   :  { %p127_p8 = scmp.ne.s32.totalorder %s204_s1, %s126_s25  ;;  %p130_p9 = scmp.lt.u32.totalorder %s126_s25, %s204_s1 }
  0x15   :  { %p132_p10 = pnand %p130_p9, %p127_p8 }
  0x17   :  { %135 = shalt.err (!%p132_p10)
}
  0x18   :  { %s136_s30 = scalar_lea.vmem %s26_s12, 128  ;;  %p141_p12 = scmp.lt.s32.totalorder %s26_s12, %s26_s12 }
  0x19   :  { %p137_p11 = scmp.ne.s32.totalorder %s26_s12, %s136_s30  ;;  %p142_p13 = scmp.lt.s32.totalorder %s136_s30, %s136_s30 }
  0x1b   :  { %p143_p0 = por %p142_p13, %p141_p12 }
  0x1d   :  { %p144_p1 = pnand %p143_p0, %p137_p11 }
  0x1f   :  { %147 = shalt.err (!%p144_p1)
}
  0x20   :  { %28 = dma.hbm_to_vmem [thread:$0]  %s204_s1, 128, %s26_s12, [#allocation5]  }
  0x21   :  { %148 = dma.done.wait [#allocation3], 128  }
  0x22   :  { %149 = vsyncadd [#allocation3], 4294967168 }
  0x23   :  { %150 = dma.done.wait [#allocation5], 128  }
  0x24   :  { %151 = vsyncadd [#allocation5], 4294967168  ;;  %vm43_vm0 = vcmask 261120   ;;  %v35_v0 = vld [vmem:[#allocation2] sm:$0xff]  ;;  %v36_v2 = vlaneseq  ;;  %v39_v7 = vld [vmem:[#allocation4] sm:$0xff]  ;;  %vm154_vm3 = vmmov 1  }
  0x25   :  { %v44_v1 = vsel %vm43_vm0, %v35_v0, -inf  ;;  %vm40_vm2 = vcmp.gt.f32.partialorder %v39_v7, 0.5  ;;  %v155_v11 = vmov 0.0   ;;  %vm86_vm7 = vcmask 7168  }
  0x26   :  { %45 = vmax.xlane.f32.xlu0 %v44_v1  ;;  %v37_v4 = vand.u32 127, %v36_v2 }
  0x28   :  { %vm38_vm1 = vcmp.eq.s32.totalorder %v37_v4, 0 }
  0x29   :  { %vm41_vm4 = vmxor %vm38_vm1, %vm154_vm3 }
  0x2a   :  { %vm42_vm5 = vmand %vm40_vm2, %vm41_vm4 }
  0x2b   :  { %vm50_vm6 = vmor %vm42_vm5, %vm38_vm1  ;;  %v67_v12 = vsel %vm42_vm5, 1.0, %v155_v11  ;;  %v71_v13 = vsel %vm42_vm5, %v35_v0, 0.0 }
  0x2c   :  { %v68_v16 = vsel %vm43_vm0, %v67_v12, 0.0  ;;  %v72_v17 = vsel %vm43_vm0, %v71_v13, 0.0 }
  0xb3   :  { %v46_v3 = vpop.xlane.xlu0 %45 }
  0xb4   :  { %v47_v5 = vsub.f32 %v35_v0, %v46_v3 }
  0xb6   :  { %v48_v6 = vmul.f32 1.442695, %v47_v5 }
  0xb8   :  { %98 = vpow2.f32 %v48_v6 }
  0xc2   :  { %v99_v8 = vpop.eup %98 }
  0xc3   :  { %v55_v9 = vsel %vm42_vm5, 0.0, %v99_v8  ;;  %v51_v10 = vsel %vm50_vm6, %v99_v8, 0.0 }
  0xc4   :  { %v56_v14 = vsel %vm43_vm0, %v55_v9, 0.0  ;;  %v52_v15 = vsel %vm43_vm0, %v51_v10, 0.0 }
  0xc5   :  { %57 = vadd.xlane.f32.xlu1 %v56_v14  ;;  %53 = vadd.xlane.f32.xlu0 %v52_v15 }
  0xc9   :  { %69 = vadd.xlane.f32.xlu1 %v68_v16  ;;  %73 = vadd.xlane.f32.xlu0 %v72_v17 }
 0x152   :  { %v58_v18 = vpop.xlane.xlu1 %57  ;;  %v54_v19 = vpop.xlane.xlu0 %53 }
 0x153   :  { %v63_v20 = vmax.f32 %v58_v18, 1.1754944e-38  ;;  %v59_v21 = vmax.f32 %v54_v19, 1.1754944e-38 }
 0x155   :  { %100 = vlog2.f32 %v63_v20 }
 0x156   :  { %102 = vlog2.f32 %v59_v21  ;;  %v70_v26 = vpop.xlane.xlu1 %69  ;;  %v74_v29 = vpop.xlane.xlu0 %73 }
 0x15f   :  { %v101_v22 = vpop.eup %100 }
 0x160   :  { %v103_v23 = vpop.eup %102  ;;  %v65_v24 = vmul.f32 0.6931472, %v101_v22 }
 0x161   :  { %v61_v25 = vmul.f32 0.6931472, %v103_v23 }
 0x162   :  { %v66_v27 = vadd.f32 %v65_v24, %v46_v3 }
 0x163   :  { %v62_v28 = vadd.f32 %v61_v25, %v46_v3 }
 0x164   :  { %v77_v31 = vsub.f32 %v66_v27, %v35_v0 }
 0x165   :  { %v75_v30 = vmul.f32 %v70_v26, %v62_v28 }
 0x167   :  { %v76_v32 = vsub.f32 %v75_v30, %v74_v29 }
 0x169   :  { %v78_v33 = vadd.f32 %v77_v31, %v76_v32 }
 0x16b   :  { %87 = vst.msk [vmem:[%s205_s2] sm:$0xff] %vm86_vm7, %v78_v33 }
 0x16c   :  { %92 = vsyncpa [#allocation3], 1 }
 0x16d   :  { %93 = vsyncpa [#allocation5], 1 }

</bundles_post_ra>
